<compile_context>
chip_gen: v7x
topology: tpu7x:2x2x1
jax: 0.10.0
libtpu: 0.0.40
codegen_flags: <defaults>
</compile_context>

<pallas_src>
import jax
import jax.numpy as jnp
from jax import lax
from jax.experimental import pallas as pl
from jax.experimental.pallas import tpu as pltpu


_VMEM_LIMIT = 40 * 1024 * 1024   # below v7x's 64 MiB physical VMEM


# --------------------------------------------------------------------------- #
# Kernel 1: Conv1d(k=3, pad=1) + ReLU + BatchNorm1d (eval mode, folded affine) #
# --------------------------------------------------------------------------- #
def _conv_relu_bn_kernel(x_ref, w_ref, b_ref, scale_ref, shift_ref, o_ref):
    # x_ref    : (T, BB, Din)   time-major input block
    # w_ref    : (3*Din, Cc)    im2col conv weight, rows ordered [tap0 | tap1 | tap2]
    # b_ref    : (1, Cc)        conv bias
    # scale_ref: (1, Cc)        gamma / sqrt(running_var + eps)
    # shift_ref: (1, Cc)        beta - running_mean * scale
    # o_ref    : (T, BB, Cc)
    T, BB, Din = x_ref.shape
    Cc = w_ref.shape[1]

    x = x_ref[...].astype(jnp.float32)               # single upcast, reused 3x
    z = jnp.zeros((1, BB, Din), jnp.float32)
    # padding=1 handled in-kernel: x[t-1] / x[t+1] with zero boundaries.
    xm1 = jnp.concatenate([z, x[:T - 1]], axis=0)    # x[t-1]
    xp1 = jnp.concatenate([x[1:], z], axis=0)        # x[t+1]
    im2col = jnp.concatenate([xm1, x, xp1], axis=-1).reshape(T * BB, 3 * Din)

    acc = jnp.dot(im2col, w_ref[...], preferred_element_type=jnp.float32) + b_ref[...]
    acc = jnp.maximum(acc, 0.0)                      # ReLU
    acc = acc * scale_ref[...] + shift_ref[...]      # BatchNorm1d (eval, folded)
    o_ref[...] = acc.reshape(T, BB, Cc).astype(o_ref.dtype)


# --------------------------------------------------------------------------- #
# Kernel 2: one bidirectional LSTM layer, forward+backward fused per time step #
# --------------------------------------------------------------------------- #
def _bilstm_kernel(x_ref, wih_ref, whh_ref, b_ref, o_ref, gx_ref):
    # x_ref  : (T, BB, Cin)   time-major layer input block
    # wih_ref: (Cin, 8H)      columns = [fwd i,f,g,o | bwd i,f,g,o]
    # whh_ref: (2H, 8H)       block-diagonal: rows = [h_fwd | h_bwd]
    # b_ref  : (1, 8H)        b_ih + b_hh, both directions
    # o_ref  : (T, BB, 2H)    [..., :H] = forward, [..., H:] = backward
    # gx_ref : (T, BB, 8H)    VMEM scratch: whole-sequence input-gate pre-activations
    T, BB, Cin = x_ref.shape
    H8 = whh_ref.shape[1]
    H = H8 // 8
    H4 = 4 * H

    # All input-gate contributions for BOTH directions in one big MXU matmul,
    # staged in VMEM scratch so the recurrence only keeps one step live.
    x2d = x_ref[...].reshape(T * BB, Cin).astype(jnp.float32)
    gx_ref[...] = (jnp.dot(x2d, wih_ref[...], preferred_element_type=jnp.float32)
                   + b_ref[...]).reshape(T, BB, H8)

    whh = whh_ref[...]                               # resident across the recurrence

    def act(g, c):
        # g: (BB, 4H) pre-activations in PyTorch i,f,g,o order; c: (BB, H)
        i = jax.nn.sigmoid(g[:, 0:H])
        f = jax.nn.sigmoid(g[:, H:2 * H])
        gg = jnp.tanh(g[:, 2 * H:3 * H])
        o = jax.nn.sigmoid(g[:, 3 * H:4 * H])
        c = f * c + i * gg
        return o * jnp.tanh(c), c

    def step(t, carry):
        h, c_f, c_b = carry                          # h: (BB, 2H) = [h_f | h_b]
        tb = T - 1 - t
        # One N=256-wide recurrence matmul drives both direction chains.
        g_hh = jnp.dot(h, whh, preferred_element_type=jnp.float32)     # (BB, 8H)
        g_f = gx_ref[t, :, 0:H4] + g_hh[:, 0:H4]
        g_b = gx_ref[tb, :, H4:H8] + g_hh[:, H4:H8]
        h_f, c_f = act(g_f, c_f)
        h_b, c_b = act(g_b, c_b)
        o_ref[t, :, 0:H] = h_f.astype(o_ref.dtype)
        o_ref[tb, :, H:2 * H] = h_b.astype(o_ref.dtype)
        return jnp.concatenate([h_f, h_b], axis=-1), c_f, c_b

    h0 = jnp.zeros((BB, 2 * H), jnp.float32)
    c0 = jnp.zeros((BB, H), jnp.float32)
    lax.fori_loop(0, T, step, (h0, c0, c0), unroll=2)


# --------------------------------------------------------------------------- #
# Kernel 3: temporal attention (softmax over time) + weighted sum + classifier #
# --------------------------------------------------------------------------- #
def _attn_fc_kernel(x_ref, wa_ref, ba_ref, wf_ref, bf_ref, o_ref):
    # x_ref : (T, BB, F2)  time-major LSTM output block (F2 = 2H).
    #         NOTE: softmax needs the FULL time axis resident (never tile T).
    # wa_ref: (1, F2)      attention weight row
    # ba_ref: (1, 1)       attention bias
    # wf_ref: (F2, C)      classifier weight, pre-transposed
    # bf_ref: (1, C)       classifier bias
    # o_ref : (BB, C)
    x = x_ref[...].astype(jnp.float32)               # single upcast, reused

    # Attention logits via VPU multiply + lane reduction (no N=1 matmul).
    scores = jnp.sum(x * wa_ref[...], axis=-1) + ba_ref[...]           # (T, BB)

    m = jnp.max(scores, axis=0, keepdims=True)
    e = jnp.exp(scores - m)
    denom = jnp.sum(e, axis=0, keepdims=True)
    w = e * pl.reciprocal(denom, approx=False)       # softmax over TIME (exact)

    attended = jnp.sum(w[:, :, None] * x, axis=0)                      # (BB, F2)
    logits = jnp.dot(attended, wf_ref[...],
                     preferred_element_type=jnp.float32) + bf_ref[...]
    o_ref[...] = logits.astype(o_ref.dtype)


# --------------------------------------------------------------------------- #
# Wrapper                                                                      #
# --------------------------------------------------------------------------- #
def _pick_batch_block(B, T, feat_width, budget_bytes=20 << 20):
    """Largest batch block that divides B, is the full batch or a multiple of 8
    (sublane tiling of the (T, BB, F) blocks), and keeps the per-grid-step VMEM
    footprint (f32, double-buffered in/out + scratch) under `budget_bytes` so
    the sizing also fits v7x's 64 MiB VMEM."""
    per_b = 4 * T * feat_width * 2
    if B * per_b <= budget_bytes or B < 16:
        return B
    cap = min((B // 8) * 8, max(8, (budget_bytes // per_b) // 8 * 8))
    for bb in range(int(cap), 7, -8):
        if B % bb == 0:
            return bb
    return B


def cnn_bilstm_temporal_attention(x, params, *, batch_block=None):
    """x: (B, T, input_dim) float32 -> logits (B, num_classes)."""
    f32 = jnp.float32
    B, T, Din = x.shape
    Cc = params["conv_w"].shape[0]

    lstm_feat = 0
    for lp in params["lstm"]:
        Hl = lp["whh_f"].shape[1]
        lstm_feat = max(lstm_feat, lp["wih_f"].shape[1] + 10 * Hl)
    feat_width = max(4 * Din + Cc, lstm_feat, 1)
    BB = batch_block or _pick_batch_block(B, T, feat_width)
    grid_b = B // BB

    cparams = pltpu.CompilerParams(dimension_semantics=("parallel",),
                                   vmem_limit_bytes=_VMEM_LIMIT)

    # ---- fold / pre-transpose parameters once, in the wrapper ---------------
    w_im2col = jnp.transpose(params["conv_w"], (2, 1, 0)).reshape(3 * Din, Cc).astype(f32)
    conv_b = params["conv_b"].reshape(1, Cc).astype(f32)
    # TODO(synk): training-mode BatchNorm1d (batch statistics) is not implemented;
    # eval-mode running stats are folded into a per-channel affine.
    scale1d = params["bn_gamma"] / jnp.sqrt(params["bn_var"] + params["bn_eps"])
    shift1d = params["bn_beta"] - params["bn_mean"] * scale1d
    bn_scale = scale1d.reshape(1, Cc).astype(f32)
    bn_shift = shift1d.reshape(1, Cc).astype(f32)

    # Only wrapper-side activation movement: one transpose of the (smallest,
    # Din-wide) raw input to time-major.  Everything downstream stays (T, B, F).
    x_tm = jnp.transpose(x, (1, 0, 2))                                # (T, B, Din)

    # ---- 1) Conv1d + ReLU + BN: one im2col matmul per batch block -----------
    h_tm = pl.pallas_call(
        _conv_relu_bn_kernel,
        out_shape=jax.ShapeDtypeStruct((T, B, Cc), f32),
        grid_spec=pltpu.PrefetchScalarGridSpec(
            num_scalar_prefetch=0,
            grid=(grid_b,),
            in_specs=[
                pl.BlockSpec((T, BB, Din), lambda b: (0, b, 0)),
                pl.BlockSpec((3 * Din, Cc), lambda b: (0, 0)),        # resident
                pl.BlockSpec((1, Cc), lambda b: (0, 0)),
                pl.BlockSpec((1, Cc), lambda b: (0, 0)),
                pl.BlockSpec((1, Cc), lambda b: (0, 0)),
            ],
            out_specs=pl.BlockSpec((T, BB, Cc), lambda b: (0, b, 0)),
        ),
        compiler_params=cparams,
    )(x_tm, w_im2col, conv_b, bn_scale, bn_shift)

    # ---- 2) stacked BiLSTM (fused directions, batch-blocked grid) -----------
    for lp in params["lstm"]:
        H = lp["whh_f"].shape[1]
        Cin_l = h_tm.shape[2]
        wih = jnp.concatenate([jnp.transpose(lp["wih_f"]),
                               jnp.transpose(lp["wih_b"])], axis=1).astype(f32)   # (Cin_l, 8H)
        whh = jnp.zeros((2 * H, 8 * H), f32)                                      # block-diagonal
        whh = whh.at[:H, :4 * H].set(jnp.transpose(lp["whh_f"]).astype(f32))
        whh = whh.at[H:, 4 * H:].set(jnp.transpose(lp["whh_b"]).astype(f32))
        bias = jnp.concatenate([lp["bih_f"] + lp["bhh_f"],
                                lp["bih_b"] + lp["bhh_b"]]).reshape(1, 8 * H).astype(f32)

        h_tm = pl.pallas_call(
            _bilstm_kernel,
            out_shape=jax.ShapeDtypeStruct((T, B, 2 * H), f32),
            grid_spec=pltpu.PrefetchScalarGridSpec(
                num_scalar_prefetch=0,
                grid=(grid_b,),
                in_specs=[
                    pl.BlockSpec((T, BB, Cin_l), lambda b: (0, b, 0)),
                    pl.BlockSpec((Cin_l, 8 * H), lambda b: (0, 0)),   # resident
                    pl.BlockSpec((2 * H, 8 * H), lambda b: (0, 0)),
                    pl.BlockSpec((1, 8 * H), lambda b: (0, 0)),
                ],
                out_specs=pl.BlockSpec((T, BB, 2 * H), lambda b: (0, b, 0)),
                scratch_shapes=[pltpu.VMEM((T, BB, 8 * H), jnp.float32)],
            ),
            compiler_params=cparams,
        )(h_tm, wih, whh, bias)

    # ---- 3) temporal attention + classifier ----------------------------------
    F2 = h_tm.shape[2]
    C = params["fc_w"].shape[0]
    wa = params["attn_w"].reshape(1, F2).astype(f32)
    ba = params["attn_b"].reshape(1, 1).astype(f32)
    wf = jnp.transpose(params["fc_w"]).astype(f32)                    # (F2, C)
    bf = params["fc_b"].reshape(1, C).astype(f32)

    logits = pl.pallas_call(
        _attn_fc_kernel,
        out_shape=jax.ShapeDtypeStruct((B, C), f32),
        grid_spec=pltpu.PrefetchScalarGridSpec(
            num_scalar_prefetch=0,
            grid=(grid_b,),
            in_specs=[
                pl.BlockSpec((T, BB, F2), lambda b: (0, b, 0)),
                pl.BlockSpec((1, F2), lambda b: (0, 0)),              # resident
                pl.BlockSpec((1, 1), lambda b: (0, 0)),
                pl.BlockSpec((F2, C), lambda b: (0, 0)),
                pl.BlockSpec((1, C), lambda b: (0, 0)),
            ],
            out_specs=pl.BlockSpec((BB, C), lambda b: (b, 0)),
        ),
        compiler_params=cparams,
    )(h_tm, wa, ba, wf, bf)
    return logits


# --------------------------------------------------------------------------- #
# Pure-JAX reference (independent implementation for correctness check)        #
# --------------------------------------------------------------------------- #
def _reference_forward(x, params):
    w, b = params["conv_w"], params["conv_b"]
    x_nct = jnp.transpose(x, (0, 2, 1))                               # (B, Cin, T)
    y = lax.conv_general_dilated(x_nct, w, window_strides=(1,), padding=((1, 1),),
                                 dimension_numbers=("NCH", "OIH", "NCH"))
    y = y + b[None, :, None]
    y = jnp.maximum(y, 0.0)
    scale = params["bn_gamma"] / jnp.sqrt(params["bn_var"] + params["bn_eps"])
    y = (y - params["bn_mean"][None, :, None]) * scale[None, :, None] \
        + params["bn_beta"][None, :, None]
    h = jnp.transpose(y, (0, 2, 1))                                   # (B, T, Cout)

    def lstm_dir(seq, wih, whh, bih, bhh, reverse):
        H = whh.shape[1]
        Bb = seq.shape[0]

        def step(carry, x_t):
            hh, cc = carry
            g = x_t @ wih.T + hh @ whh.T + bih + bhh
            i = jax.nn.sigmoid(g[:, 0:H])
            f = jax.nn.sigmoid(g[:, H:2 * H])
            gg = jnp.tanh(g[:, 2 * H:3 * H])
            o = jax.nn.sigmoid(g[:, 3 * H:4 * H])
            cc = f * cc + i * gg
            hh = o * jnp.tanh(cc)
            return (hh, cc), hh

        xs = jnp.transpose(seq, (1, 0, 2))
        if reverse:
            xs = xs[::-1]
        init = (jnp.zeros((Bb, H), jnp.float32), jnp.zeros((Bb, H), jnp.float32))
        _, hs = lax.scan(step, init, xs)
        if reverse:
            hs = hs[::-1]
        return jnp.transpose(hs, (1, 0, 2))

    out = h
    for lp in params["lstm"]:
        hf = lstm_dir(out, lp["wih_f"], lp["whh_f"], lp["bih_f"], lp["bhh_f"], False)
        hb = lstm_dir(out, lp["wih_b"], lp["whh_b"], lp["bih_b"], lp["bhh_b"], True)
        out = jnp.concatenate([hf, hb], axis=-1)

    scores = out @ params["attn_w"].T + params["attn_b"]              # (B, T, 1)
    wts = jax.nn.softmax(scores, axis=1)
    attended = jnp.sum(wts * out, axis=1)                             # (B, 2H)
    return attended @ params["fc_w"].T + params["fc_b"]


# --------------------------------------------------------------------------- #
if __name__ == "__main__":
    B, T = 2, 8
    input_dim, cnn_channels = 16, 32
    lstm_hidden, lstm_layers = 32, 1
    num_classes = 5

    keys = iter(jax.random.split(jax.random.PRNGKey(0), 32))

    def uniform(k, shape, bound):
        return jax.random.uniform(k, shape, jnp.float32, -bound, bound)

    cb = 1.0 / float(jnp.sqrt(jnp.float32(input_dim * 3)))
    params = {
        "conv_w": uniform(next(keys), (cnn_channels, input_dim, 3), cb),
        "conv_b": uniform(next(keys), (cnn_channels,), cb),
        "bn_gamma": jax.random.uniform(next(keys), (cnn_channels,), jnp.float32, 0.8, 1.2),
        "bn_beta": 0.1 * jax.random.normal(next(keys), (cnn_channels,), jnp.float32),
        "bn_mean": 0.1 * jax.random.normal(next(keys), (cnn_channels,), jnp.float32),
        "bn_var": jax.random.uniform(next(keys), (cnn_channels,), jnp.float32, 0.5, 1.5),
        "bn_eps": 1e-5,
        "lstm": [],
    }

    lb = 1.0 / float(jnp.sqrt(jnp.float32(lstm_hidden)))
    in_dim = cnn_channels
    for _ in range(lstm_layers):
        params["lstm"].append({
            "wih_f": uniform(next(keys), (4 * lstm_hidden, in_dim), lb),
            "whh_f": uniform(next(keys), (4 * lstm_hidden, lstm_hidden), lb),
            "bih_f": uniform(next(keys), (4 * lstm_hidden,), lb),
            "bhh_f": uniform(next(keys), (4 * lstm_hidden,), lb),
            "wih_b": uniform(next(keys), (4 * lstm_hidden, in_dim), lb),
            "whh_b": uniform(next(keys), (4 * lstm_hidden, lstm_hidden), lb),
            "bih_b": uniform(next(keys), (4 * lstm_hidden,), lb),
            "bhh_b": uniform(next(keys), (4 * lstm_hidden,), lb),
        })
        in_dim = 2 * lstm_hidden

    ab = 1.0 / float(jnp.sqrt(jnp.float32(2 * lstm_hidden)))
    params["attn_w"] = uniform(next(keys), (1, 2 * lstm_hidden), ab)
    params["attn_b"] = uniform(next(keys), (1,), ab)
    params["fc_w"] = uniform(next(keys), (num_classes, 2 * lstm_hidden), ab)
    params["fc_b"] = uniform(next(keys), (num_classes,), ab)

    x = jax.random.normal(next(keys), (B, T, input_dim), jnp.float32)

    out = cnn_bilstm_temporal_attention(x, params)
    out = jax.block_until_ready(out)

    ref = _reference_forward(x, params)
    assert out.shape == (B, num_classes)
    err = float(jnp.max(jnp.abs(out - ref)))
    assert err < 1e-3, f"mismatch vs reference: max abs err = {err}"

    print("KERNEL_OK")
</pallas_src>

<mosaic_0001>
module attributes {stable_mosaic.version = 11 : i64} {
  func.func @_conv_relu_bn_kernel(%arg0: i32, %arg1: memref<8x2x16xf32, #tpu.memory_space<vmem>>, %arg2: memref<48x32xf32, #tpu.memory_space<vmem>>, %arg3: memref<1x32xf32, #tpu.memory_space<vmem>>, %arg4: memref<1x32xf32, #tpu.memory_space<vmem>>, %arg5: memref<1x32xf32, #tpu.memory_space<vmem>>, %arg6: memref<8x2x32xf32, #tpu.memory_space<vmem>>) attributes {dimension_semantics = [#tpu.dimension_semantics<parallel>], iteration_bounds = array<i64: 1>, scalar_prefetch = 0 : i64, scratch_operands = 0 : i64, tpu.core_type = #tpu.core_type<tc>, window_params = [{transform_indices = @transform_0, window_bounds = array<i64: 8, 2, 16>}, {pipeline_mode = #tpu.pipeline_mode<synchronous>, transform_indices = @transform_1, window_bounds = array<i64: 48, 32>}, {pipeline_mode = #tpu.pipeline_mode<synchronous>, transform_indices = @transform_2, window_bounds = array<i64: 1, 32>}, {pipeline_mode = #tpu.pipeline_mode<synchronous>, transform_indices = @transform_3, window_bounds = array<i64: 1, 32>}, {pipeline_mode = #tpu.pipeline_mode<synchronous>, transform_indices = @transform_4, window_bounds = array<i64: 1, 32>}, {transform_indices = @transform_5, window_bounds = array<i64: 8, 2, 32>}]} {
    %c0 = arith.constant 0 : index
    %c0_0 = arith.constant 0 : index
    %c0_1 = arith.constant 0 : index
    %0 = vector.load %arg1[%c0, %c0_0, %c0_1] : memref<8x2x16xf32, #tpu.memory_space<vmem>>, vector<8x2x16xf32>
    %cst = arith.constant 0.000000e+00 : f32
    %1 = vector.broadcast %cst : f32 to vector<1x2x16xf32>
    %2 = vector.extract_strided_slice %0 {offsets = [0, 0, 0], sizes = [7, 2, 16], strides = [1, 1, 1]} : vector<8x2x16xf32> to vector<7x2x16xf32>
    %3 = tpu.concatenate %1, %2 in 0 : vector<1x2x16xf32>, vector<7x2x16xf32> -> vector<8x2x16xf32>
    %4 = vector.extract_strided_slice %0 {offsets = [1, 0, 0], sizes = [7, 2, 16], strides = [1, 1, 1]} : vector<8x2x16xf32> to vector<7x2x16xf32>
    %5 = tpu.concatenate %4, %1 in 0 : vector<7x2x16xf32>, vector<1x2x16xf32> -> vector<8x2x16xf32>
    %6 = tpu.concatenate %3, %0, %5 in 2 : vector<8x2x16xf32>, vector<8x2x16xf32>, vector<8x2x16xf32> -> vector<8x2x48xf32>
    %7 = vector.shape_cast %6 : vector<8x2x48xf32> to vector<16x48xf32>
    %c0_2 = arith.constant 0 : index
    %c0_3 = arith.constant 0 : index
    %8 = vector.load %arg2[%c0_2, %c0_3] : memref<48x32xf32, #tpu.memory_space<vmem>>, vector<48x32xf32>
    %cst_4 = arith.constant dense<0.000000e+00> : vector<16x32xf32>
    %9 = tpu.matmul %7, %8, %cst_4 {dimension_numbers = #tpu.dot_dimension_numbers<[1], [0], [0], [1], [0, 0, 1, 1], [], []>} : vector<16x48xf32>, vector<48x32xf32>, vector<16x32xf32> -> vector<16x32xf32>
    %c0_5 = arith.constant 0 : index
    %c0_6 = arith.constant 0 : index
    %10 = vector.load %arg3[%c0_5, %c0_6] : memref<1x32xf32, #tpu.memory_space<vmem>>, vector<1x32xf32>
    %11 = vector.broadcast %10 : vector<1x32xf32> to vector<16x32xf32>
    %12 = arith.addf %9, %11 : vector<16x32xf32>
    %cst_7 = arith.constant 0.000000e+00 : f32
    %13 = vector.broadcast %cst_7 : f32 to vector<16x32xf32>
    %14 = arith.maximumf %12, %13 : vector<16x32xf32>
    %c0_8 = arith.constant 0 : index
    %c0_9 = arith.constant 0 : index
    %15 = vector.load %arg4[%c0_8, %c0_9] : memref<1x32xf32, #tpu.memory_space<vmem>>, vector<1x32xf32>
    %16 = vector.broadcast %15 : vector<1x32xf32> to vector<16x32xf32>
    %17 = arith.mulf %14, %16 : vector<16x32xf32>
    %c0_10 = arith.constant 0 : index
    %c0_11 = arith.constant 0 : index
    %18 = vector.load %arg5[%c0_10, %c0_11] : memref<1x32xf32, #tpu.memory_space<vmem>>, vector<1x32xf32>
    %19 = vector.broadcast %18 : vector<1x32xf32> to vector<16x32xf32>
    %20 = arith.addf %17, %19 : vector<16x32xf32>
    %21 = vector.shape_cast %20 : vector<16x32xf32> to vector<8x2x32xf32>
    %c0_12 = arith.constant 0 : index
    %c0_13 = arith.constant 0 : index
    %c0_14 = arith.constant 0 : index
    %22 = vector.load %arg6[%c0_12, %c0_13, %c0_14] : memref<8x2x32xf32, #tpu.memory_space<vmem>>, vector<8x2x32xf32>
    tpu.vector_store %arg6[%c0_12, %c0_13, %c0_14], %21 {strides = array<i32>} : memref<8x2x32xf32, #tpu.memory_space<vmem>>, vector<8x2x32xf32>,
    return
  }
  func.func @transform_0(%arg0: i32) -> (i32, i32, i32) {
    %c0_i32 = arith.constant 0 : i32
    %c0_i32_0 = arith.constant 0 : i32
    %c0_i32_1 = arith.constant 0 : i32
    return %c0_i32, %arg0, %c0_i32_0 : i32, i32, i32
  }
  func.func @transform_1(%arg0: i32) -> (i32, i32) {
    %c0_i32 = arith.constant 0 : i32
    %c0_i32_0 = arith.constant 0 : i32
    %c0_i32_1 = arith.constant 0 : i32
    return %c0_i32, %c0_i32_0 : i32, i32
  }
  func.func @transform_2(%arg0: i32) -> (i32, i32) {
    %c0_i32 = arith.constant 0 : i32
    %c0_i32_0 = arith.constant 0 : i32
    %c0_i32_1 = arith.constant 0 : i32
    return %c0_i32, %c0_i32_0 : i32, i32
  }
  func.func @transform_3(%arg0: i32) -> (i32, i32) {
    %c0_i32 = arith.constant 0 : i32
    %c0_i32_0 = arith.constant 0 : i32
    %c0_i32_1 = arith.constant 0 : i32
    return %c0_i32, %c0_i32_0 : i32, i32
  }
  func.func @transform_4(%arg0: i32) -> (i32, i32) {
    %c0_i32 = arith.constant 0 : i32
    %c0_i32_0 = arith.constant 0 : i32
    %c0_i32_1 = arith.constant 0 : i32
    return %c0_i32, %c0_i32_0 : i32, i32
  }
  func.func @transform_5(%arg0: i32) -> (i32, i32, i32) {
    %c0_i32 = arith.constant 0 : i32
    %c0_i32_0 = arith.constant 0 : i32
    %c0_i32_1 = arith.constant 0 : i32
    return %c0_i32, %arg0, %c0_i32_0 : i32, i32, i32
  }
}

</mosaic_0001>

<bundles_post_ra>
// kernel: tpu_custom_call.1
= control target key start
LH: loop header
LB: loop body
LE: loop exit
PB: predicated region body
PF: predicated region fallthrough
CT: control target
= control target key end

     0   :  { %s398_s22 = smov 16   ;;  %s556_s0 = inlined_call_operand.vmem [shape: f32[8,2,16], index: 0, kind: input, shape index: {}]   ;;  %s557_s1 = inlined_call_operand.vmem [shape: f32[48,32], index: 1, kind: input, shape index: {}]   ;;  %s558_s2 = inlined_call_operand.vmem [shape: f32[1,32], index: 2, kind: input, shape index: {}]   ;;  %s559_s3 = inlined_call_operand.vmem [shape: f32[1,32], index: 3, kind: input, shape index: {}]   ;;  %s560_s4 = inlined_call_operand.vmem [shape: f32[1,32], index: 4, kind: input, shape index: {}]   ;;  %s561_s5 = inlined_call_operand.hbm [shape: f32[8,2,32], index: 5, kind: output, shape index: {}]  }
   0x1   :  { %v437_v0 = vld [vmem:[%s556_s0 + $0x4] sm:$0x3]  ;;  %v21_v1 = vld [vmem:[%s556_s0] sm:$0x3]  ;;  %v446_v2 = vld [vmem:[%s556_s0 + $0x6] sm:$0x3] }
   0x2   :  { %41 = vrot.lane.b32.xlu1 %v437_v0, %s398_s22  ;;  %37 = vrot.lane.b32.xlu0 %v21_v1, %s398_s22  ;;  %v22_v3 = vld [vmem:[%s556_s0 + $0x2] sm:$0x3] }
   0x3   :  { %10 = vsyncpa [#allocation3], 0  ;;  %v455_v4 = vld [vmem:[%s556_s0 + $0xa] sm:$0x3]  ;;  %v460_v5 = vld [vmem:[%s556_s0 + $0x8] sm:$0x3]  ;;  %v130_v28 = vlaneseq }
   0x4   :  { %v104_v6 = vld [vmem:[%s557_s1] sm:$0xff]  ;;  %v105_v7 = vld [vmem:[%s557_s1 + $0x8] sm:$0xff]  ;;  %v106_v11 = vld [vmem:[%s557_s1 + $0x10] sm:$0xff]  ;;  %s399_s21 = smov 32   ;;  %v400_v17 = vmov 0.0   ;;  %vm86_vm0 = vcmask 130048  }
   0x5   :  { %v356_v8 = vpack.c.bf16 %v105_v7, %v104_v6  ;;  %v28_v9 = vld [vmem:[%s556_s0 + $0xe] sm:$0x3]  ;;  %v476_v10 = vld [vmem:[%s556_s0 + $0xc] sm:$0x3]  ;;  %v107_v12 = vld [vmem:[%s557_s1 + $0x18] sm:$0xff]  ;;  %vm95_vm1 = vcmask 261120  }
   0x6   :  { %43 = vrot.lane.b32.xlu1 %v446_v2, %s398_s22  ;;  %39 = vrot.lane.b32.xlu0 %v22_v3, %s398_s22  ;;  %v360_v13 = vpack.c.bf16 %v107_v12, %v106_v11  ;;  %v108_v14 = vld [vmem:[%s557_s1 + $0x20] sm:$0xff]  ;;  %v109_v15 = vld [vmem:[%s557_s1 + $0x28] sm:$0xff]  ;;  %v401_v26 = vmov 1983009808   ;;  %v131_v34 = vshrl.u32 %v130_v28, 7  ;;  %vm159_vm2 = vcmask 392192  }
   0x7   :  { %357 = vmatprep.subr.bf16.mxu0 %v356_v8  ;;  %v364_v16 = vpack.c.bf16 %v109_v15, %v108_v14  ;;  %v128_v27 = vunpack.c.l.s4 %v401_v26  ;;  %v331_v6 = vld [vmem:[%s559_s3] ss:$0 sm:$0xff]  ;;  %vm303_vm3 = vcmask 254976  }
   0x8   :  { %359 = vmatpush3.bf16.msra.mxu0 %v356_v8 }
   0x9   :  { %361 = vmatprep.subr.bf16.mxu0 %v360_v13  ;;  %v129_v33 = vunpack.c.0.s8 %v128_v27 }
   0xa   :  { %47 = vrot.lane.b32.xlu1 %v455_v4, %s398_s22  ;;  %45 = vrot.lane.b32.xlu0 %v460_v5, %s398_s22 }
   0xb   :  { %v132_v42 = vsub.s32 %v129_v33, %v131_v34 }
   0xc   :  { %363 = vmatpush3.bf16.msra.mxu0 %v360_v13 }
   0xd   :  { %365 = vmatprep.subr.bf16.mxu0 %v364_v16 }
   0xe   :  { %51 = vrot.lane.b32.xlu1 %v28_v9, %s398_s22  ;;  %49 = vrot.lane.b32.xlu0 %v476_v10, %s398_s22 }
  0x10   :  { %367 = vmatpush3.bf16.msra.mxu0 %v364_v16 }
  0x12   :  { %64 = vrot.lane.b32.xlu1 %v437_v0, %s399_s21  ;;  %62 = vrot.lane.b32.xlu0 %v22_v3, %s399_s21 }
  0x16   :  { %68 = vrot.lane.b32.xlu1 %v460_v5, %s399_s21  ;;  %66 = vrot.lane.b32.xlu0 %v446_v2, %s399_s21 }
  0x1a   :  { %72 = vrot.lane.b32.xlu1 %v476_v10, %s399_s21  ;;  %70 = vrot.lane.b32.xlu0 %v455_v4, %s399_s21 }
  0x1e   :  { %76 = vrot.lane.b32.xlu1 %v400_v17, %s399_s21  ;;  %74 = vrot.lane.b32.xlu0 %v28_v9, %s399_s21  ;;  %v332_v9 = vld [vmem:[%s560_s4] ss:$0 sm:$0xff] }
  0x74   :  { %v42_v18 = vpop.permute.xlu1 %41  ;;  %v38_v19 = vpop.permute.xlu0 %37 }
  0x75   :  { %v87_v29 = vsel %vm86_vm0, 0.0, %v38_v19  ;;  %v89_v37 = vsel %vm86_vm0, %v22_v3, %v42_v18 }
  0x78   :  { %v44_v20 = vpop.permute.xlu1 %43  ;;  %v40_v21 = vpop.permute.xlu0 %39 }
  0x79   :  { %v88_v30 = vsel %vm86_vm0, %v21_v1, %v40_v21  ;;  %v90_v38 = vsel %vm86_vm0, %v437_v0, %v44_v20 }
  0x7c   :  { %v48_v22 = vpop.permute.xlu1 %47  ;;  %v46_v23 = vpop.permute.xlu0 %45 }
  0x7d   :  { %v92_v46 = vsel %vm86_vm0, %v460_v5, %v48_v22  ;;  %v91_v47 = vsel %vm86_vm0, %v446_v2, %v46_v23  ;;  %v328_v2 = vld [vmem:[%s558_s2] ss:$0 sm:$0xff]  ;;  %s402_s2 = smov [#allocation2]  }
  0x7e   :  { %s317_s3 = sshll.u32 %s402_s2, 4  ;;  %s318_s3 = int_to_ptr.vmem [resolvable:$true] %s317_s3 }
  0x7f   :  { %s374_s4 = scalar_lea.vmem %s318_s3, 256  ;;  %p379_p1 = scmp.lt.s32.totalorder %s318_s3, %s318_s3 }
  0x80   :  { %v52_v24 = vpop.permute.xlu1 %51  ;;  %v50_v25 = vpop.permute.xlu0 %49  ;;  %p375_p0 = scmp.ne.s32.totalorder %s318_s3, %s374_s4  ;;  %p380_p2 = scmp.lt.s32.totalorder %s374_s4, %s374_s4 }
  0x81   :  { %v94_v55 = vsel %vm86_vm0, %v476_v10, %v52_v24  ;;  %v93_v56 = vsel %vm86_vm0, %v455_v4, %v50_v25 }
  0x82   :  { %p381_p3 = por %p380_p2, %p379_p1 }
  0x84   :  { %v65_v31 = vpop.permute.xlu1 %64  ;;  %v63_v32 = vpop.permute.xlu0 %62  ;;  %p382_p4 = pnand %p381_p3, %p375_p0 }
  0x85   :  { %v97_v35 = vsel %vm95_vm1, %v88_v30, %v65_v31  ;;  %v96_v36 = vsel %vm95_vm1, %v87_v29, %v63_v32 }
  0x86   :  { %v125_v39 = vcombine.low %v96_v36, %v97_v35 }
  0x88   :  { %v69_v40 = vpop.permute.xlu1 %68  ;;  %v67_v41 = vpop.permute.xlu0 %66  ;;  %v133_v50 = vrot.slane %v125_v39, %v132_v42 }
  0x89   :  { %v99_v43 = vsel %vm95_vm1, %v90_v38, %v69_v40  ;;  %v98_v44 = vsel %vm95_vm1, %v89_v37, %v67_v41 }
  0x8a   :  { %v126_v45 = vcombine.low %v98_v44, %v99_v43 }
  0x8c   :  { %v73_v48 = vpop.permute.xlu1 %72  ;;  %v71_v49 = vpop.permute.xlu0 %70  ;;  %v140_v51 = vrot.slane %v126_v45, %v132_v42 }
  0x8d   :  { %v101_v52 = vsel %vm95_vm1, %v92_v46, %v73_v48  ;;  %v100_v53 = vsel %vm95_vm1, %v91_v47, %v71_v49 }
  0x8e   :  { %v141_v54 = vcombine.low %v133_v50, %v140_v51  ;;  %v142_v57 = vcombine.low %v100_v53, %v101_v52 }
  0x90   :  { %v77_v58 = vpop.permute.xlu1 %76  ;;  %353 = vmatprep.mubr.msk.f32.mxu0 %vm159_vm2, %v141_v54  ;;  %v75_v59 = vpop.permute.xlu0 %74  ;;  %v150_v63 = vrot.slane %v142_v57, %v132_v42 }
  0x91   :  { %v103_v60 = vsel %vm95_vm1, %v94_v55, %v77_v58  ;;  %v102_v61 = vsel %vm95_vm1, %v93_v56, %v75_v59 }
  0x92   :  { %v143_v62 = vcombine.low %v102_v61, %v103_v60 }
  0x94   :  { %v157_v0 = vrot.slane %v143_v62, %v132_v42 }
  0x96   :  { %v158_v1 = vcombine.low %v150_v63, %v157_v0 }
  0x98   :  { %354 = vmatmul.mubr.msk.f32.vlgmr.msra.gmra.mrb[0].mxu0 %vm159_vm2, %v158_v1 }
 0x16b   :  { %v355_v3 = vpop.f32.mrb[0].mxu0 }
 0x16c   :  { %v236_v5 = vadd.f32 %v355_v3, %v328_v2  ;;  %v230_v4 = vpop.f32.mrb[1].mxu0 }
 0x16d   :  { %v231_v7 = vadd.f32 %v328_v2, %v230_v4 }
 0x16e   :  { %v240_v8 = vmax.f32 %v236_v5, 0.0 }
 0x16f   :  { %v239_v10 = vmax.f32 %v231_v7, 0.0 }
 0x170   :  { %v249_v11 = vmul.f32 %v331_v6, %v240_v8 }
 0x171   :  { %v248_v12 = vmul.f32 %v331_v6, %v239_v10 }
 0x172   :  { %v258_v13 = vadd.f32 %v332_v9, %v249_v11 }
 0x173   :  { %v257_v14 = vadd.f32 %v332_v9, %v248_v12 }
 0x174   :  { %v278_v15 = vcombine.high %v258_v13, %v258_v13  ;;  %v285_v16 = vrot.slane %v258_v13, %v132_v42 }
 0x175   :  { %v261_v17 = vcombine.high %v257_v14, %v257_v14  ;;  %v268_v18 = vrot.slane %v257_v14, %v132_v42 }
 0x176   :  { %v292_v19 = vrot.slane %v278_v15, %v132_v42  ;;  %v293_v20 = vcombine.high %v285_v16, %v285_v16  ;;  %308 = vst.msk [vmem:[#allocation2 + $0x8] sm:$0x3] %vm303_vm3, %v285_v16 }
 0x177   :  { %v275_v21 = vrot.slane %v261_v17, %v132_v42  ;;  %v276_v22 = vcombine.high %v268_v18, %v268_v18  ;;  %304 = vst.msk [vmem:[#allocation2] sm:$0x3] %vm303_vm3, %v268_v18 }
 0x178   :  { %v294_v23 = vcombine.high %v292_v19, %v292_v19  ;;  %309 = vst.msk [vmem:[#allocation2 + $0xa] sm:$0x3] %vm303_vm3, %v293_v20  ;;  %310 = vst.msk [vmem:[#allocation2 + $0xc] sm:$0x3] %vm303_vm3, %v292_v19 }
 0x179   :  { %v277_v24 = vcombine.high %v275_v21, %v275_v21  ;;  %305 = vst.msk [vmem:[#allocation2 + $0x2] sm:$0x3] %vm303_vm3, %v276_v22  ;;  %306 = vst.msk [vmem:[#allocation2 + $0x4] sm:$0x3] %vm303_vm3, %v275_v21 }
 0x17a   :  { %311 = vst.msk [vmem:[#allocation2 + $0xe] sm:$0x3] %vm303_vm3, %v294_v23 }
 0x17b   :  { %307 = vst.msk [vmem:[#allocation2 + $0x6] sm:$0x3] %vm303_vm3, %v277_v24 }
 0x17c   :  { %385 = shalt.err (!%p382_p4)
}
 0x17d   :  { %s386_s29 = scalar_lea.hbm %s561_s5, 256 }
 0x17e   :  { %p387_p5 = scmp.ne.s32.totalorder %s561_s5, %s386_s29  ;;  %p390_p6 = scmp.lt.u32.totalorder %s386_s29, %s561_s5 }
 0x180   :  { %p392_p7 = pnand %p390_p6, %p387_p5 }
 0x182   :  { %395 = shalt.err (!%p392_p7)
}
 0x183   :  { %s403_s9 = smov 2  }
 0x184   :  { %323 = dma.vmem_to_hbm [thread:$0]  %s318_s3, 256, %s561_s5, [#allocation3], %s399_s21, %s399_s21, %s403_s9  }
 0x185   :  { %396 = dma.done.wait [#allocation3], 256  }
 0x186   :  { %397 = vsyncadd [#allocation3], 4294967040 }
 0x187   :  { %327 = vsyncpa [#allocation3], 1 }

</bundles_post_ra>
